<compile_context>
chip_gen: v6e
topology: v6e:2x2x1
jax: 0.10.0
libtpu: 0.0.40
codegen_flags: <defaults>
</compile_context>

<pallas_src>
import functools

import jax
import jax.numpy as jnp
from jax import lax
from jax.experimental import pallas as pl
from jax.experimental.pallas import tpu as pltpu


def _keep_mask(shape, seed, p):
    """Bernoulli(1 - p) keep mask from a stateless int32 hash (murmur3 fmix32).

    Logical right shift is emulated as (arithmetic >> k) & ((1 << (32-k)) - 1)
    so everything stays in int32 ops known to lower in Mosaic; this fixes the
    sign-extension bias flagged in review.  Two mixing multiplies.
    """
    rows = lax.broadcasted_iota(jnp.int32, shape, 0)
    cols = lax.broadcasted_iota(jnp.int32, shape, 1)
    z = rows * jnp.int32(shape[1]) + cols
    z = z ^ (seed * jnp.int32(-1640531535))                              # seed * 0x9E3779B1 (scalar)
    z = (z ^ ((z >> 16) & jnp.int32(0xFFFF))) * jnp.int32(-2048144789)   # * 0x85EBCA6B
    z = (z ^ ((z >> 13) & jnp.int32(0x7FFFF))) * jnp.int32(-1028477387)  # * 0xC2B2AE35
    z = z ^ ((z >> 16) & jnp.int32(0xFFFF))
    bits = (z >> 1) & jnp.int32(0x7FFFFFFF)                              # uniform in [0, 2^31)
    thresh = min(int(round(p * 2147483648.0)), 2**31 - 1)                # clamp (review concern)
    return bits >= jnp.int32(thresh)                                     # P(keep) = 1 - p


def gcn_kernel(seed_ref, a_ref, slab_ref, o_ref, *,
               n, in_feats, hidden, out_feats, p, training):
    # Static row offsets into the packed slab (see pack_gcn_slab).
    r_w2 = hidden
    r_b2 = hidden + out_feats
    r_xt = hidden + 2 * out_feats

    a = a_ref[...]                                             # [N, N]  (== A^T; A symmetric)
    w1t = slab_ref[0:hidden, 0:in_feats]                       # [hidden, in_feats] = W1^T
    b1t = slab_ref[0:hidden, in_feats:in_feats + 1]            # [hidden, 1]        = b1^T
    w2t = slab_ref[r_w2:r_w2 + out_feats, 0:hidden]            # [out_feats, hidden] = W2^T
    b2t = slab_ref[r_b2:r_b2 + out_feats, 0:1]                 # [out_feats, 1]      = b2^T
    xt = slab_ref[r_xt:r_xt + in_feats, 0:n]                   # [in_feats, N]       = X^T

    # Dropout mask first: no dependence on the matmul chain -> overlaps MXU work.
    apply_dropout = bool(training) and p > 0.0
    if apply_dropout:
        keep = _keep_mask((hidden, n), seed_ref[0], p)
        scale = jnp.float32(1.0 / (1.0 - p))

    # ---- layer 1 (transposed): H^T = relu(W1^T @ (X^T @ A^T) + b1^T) ----
    xa = jnp.dot(xt, a, preferred_element_type=jnp.float32)            # [in_feats, N]
    ht = jnp.dot(w1t, xa, preferred_element_type=jnp.float32) + b1t    # [hidden, N]
    ht = jnp.maximum(ht, 0.0)
    if apply_dropout:
        ht = jnp.where(keep, ht * scale, jnp.float32(0.0))

    # ---- layer 2 (transposed): out^T = (W2^T @ H^T) @ A^T + b2^T ----
    hwt = jnp.dot(w2t, ht, preferred_element_type=jnp.float32)         # [out_feats, N]
    out_t = jnp.dot(hwt, a, preferred_element_type=jnp.float32)        # [out_feats, N]
    o_ref[...] = out_t + b2t


def pack_gcn_slab(X, W1, b1, W2, b2, *, lanes=128):
    """Pack W1^T, b1^T, W2^T, b2^T and X^T into one zero-padded f32 slab.

    Built ONCE at init (hoisted out of the per-call path per perf review);
    together with A this leaves the kernel with just 2 tensor DMAs.
    """
    N, in_feats = X.shape
    in_feats_w, hidden = W1.shape
    out_feats = W2.shape[1]
    assert in_feats_w == in_feats
    rows = -(-(hidden + 2 * out_feats + in_feats) // 8) * 8   # pad to sublane tile
    assert max(in_feats + 1, hidden, N) <= lanes
    slab = jnp.zeros((rows, lanes), jnp.float32)
    slab = slab.at[0:hidden, 0:in_feats].set(W1.T.astype(jnp.float32))
    slab = slab.at[0:hidden, in_feats:in_feats + 1].set(
        jnp.reshape(b1, (hidden, 1)).astype(jnp.float32))
    slab = slab.at[hidden:hidden + out_feats, 0:hidden].set(W2.T.astype(jnp.float32))
    slab = slab.at[hidden + out_feats:hidden + 2 * out_feats, 0:1].set(
        jnp.reshape(b2, (out_feats, 1)).astype(jnp.float32))
    slab = slab.at[hidden + 2 * out_feats:hidden + 2 * out_feats + in_feats, 0:N].set(
        X.T.astype(jnp.float32))
    return slab


def build_gcn_forward(X, W1, b1, W2, b2, *, p=0.2, symmetric_adjacency=True):
    """Returns forward(A, seed_arr, training=bool) -> [N, out_feats].

    Slab packing, pallas_call construction and jit all happen here, once;
    the per-call path is a single jitted dispatch (perf review item 1).
    """
    assert 0.0 <= p < 1.0, "dropout p must be statically in [0, 1)"
    N, in_feats = X.shape
    hidden = W1.shape[1]
    out_feats = W2.shape[1]
    slab = pack_gcn_slab(X, W1, b1, W2, b2)

    def make_fwd(training):
        kernel = functools.partial(
            gcn_kernel, n=N, in_feats=in_feats, hidden=hidden,
            out_feats=out_feats, p=p, training=training)
        grid_spec = pltpu.PrefetchScalarGridSpec(
            num_scalar_prefetch=1,                 # dropout seed lands in SMEM
            grid=(1,),                             # N=64: do NOT tile (review item 4)
            in_specs=[
                pl.BlockSpec((N, N), lambda i, s: (0, 0)),
                pl.BlockSpec(slab.shape, lambda i, s: (0, 0)),
            ],
            out_specs=pl.BlockSpec((out_feats, N), lambda i, s: (0, 0)),
        )
        call = pl.pallas_call(
            kernel,
            out_shape=jax.ShapeDtypeStruct((out_feats, N), jnp.float32),
            grid_spec=grid_spec,
            compiler_params=pltpu.CompilerParams(
                dimension_semantics=("arbitrary",)),
        )

        @jax.jit
        def fwd(A, seed_arr, slab_arr):
            a_t = A if symmetric_adjacency else A.T    # kernel contracts against A^T
            out_t = call(seed_arr, a_t, slab_arr)      # [out_feats, N], lane-dense
            if out_feats == 1:
                return out_t.reshape(N, out_feats)     # free (no transpose op)
            return out_t.T
        return fwd

    fwd_train = make_fwd(True)
    fwd_eval = make_fwd(False)

    def forward(A, seed_arr, *, training=True):
        return (fwd_train if training else fwd_eval)(A, seed_arr, slab)

    return forward


def _glorot(key, shape):
    fan_in, fan_out = shape
    lim = jnp.sqrt(6.0 / (fan_in + fan_out))
    return jax.random.uniform(key, shape, jnp.float32, -lim, lim)


if __name__ == "__main__":
    # module config: h_layers=[16, 1], in_feats=3, dropout=0.2
    N, in_feats, hidden, out_feats, p = 64, 3, 16, 1, 0.2

    key = jax.random.PRNGKey(0)
    k_x, k_a, k_w1, k_w2 = jax.random.split(key, 4)

    # node features
    X = jax.random.normal(k_x, (N, in_feats), jnp.float32)

    # symmetric-normalized adjacency A_hat = D^-1/2 (A + I) D^-1/2 (plain-JAX glue)
    raw = (jax.random.uniform(k_a, (N, N)) < 0.1).astype(jnp.float32)
    adj = jnp.maximum(raw, raw.T) + jnp.eye(N, dtype=jnp.float32)
    d_inv_sqrt = 1.0 / jnp.sqrt(adj.sum(axis=1))
    A = adj * d_inv_sqrt[:, None] * d_inv_sqrt[None, :]   # symmetric by construction

    # deterministic GCNConv parameters (glorot weights, zero bias)
    W1 = _glorot(k_w1, (in_feats, hidden))
    b1 = jnp.zeros((1, hidden), jnp.float32)
    W2 = _glorot(k_w2, (hidden, out_feats))
    b2 = jnp.zeros((1, out_feats), jnp.float32)

    # Everything below build_gcn_forward is one-time setup (review item 1).
    forward = build_gcn_forward(X, W1, b1, W2, b2, p=p, symmetric_adjacency=True)
    seed_eval = jnp.zeros((1,), jnp.int32)
    seed_train = jnp.full((1,), 42, jnp.int32)

    # sanity check (dropout compiled out) against a pure-jnp reference
    ref = A @ jnp.maximum(A @ X @ W1 + b1, 0.0) @ W2 + b2
    out_eval = jax.block_until_ready(forward(A, seed_eval, training=False))
    assert out_eval.shape == (N, out_feats)
    assert float(jnp.max(jnp.abs(out_eval - ref))) < 1e-2

    # module forward semantics: dropout active (F.dropout default training=True)
    out = jax.block_until_ready(forward(A, seed_train, training=True))
    assert out.shape == (N, out_feats) and bool(jnp.all(jnp.isfinite(out)))
    print("KERNEL_OK")
</pallas_src>

<mosaic_0001>
module attributes {stable_mosaic.version = 11 : i64} {
  func.func @gcn_kernel(%arg0: i32, %arg1: memref<1xi32, #tpu.memory_space<smem>>, %arg2: memref<64x64xf32, #tpu.memory_space<vmem>>, %arg3: memref<24x128xf32, #tpu.memory_space<vmem>>, %arg4: memref<1x64xf32, #tpu.memory_space<vmem>>) attributes {dimension_semantics = [#tpu.dimension_semantics<arbitrary>], iteration_bounds = array<i64: 1>, scalar_prefetch = 1 : i64, scratch_operands = 0 : i64, tpu.core_type = #tpu.core_type<tc>, window_params = [{pipeline_mode = #tpu.pipeline_mode<synchronous>, transform_indices = @transform_0, window_bounds = array<i64: 64, 64>}, {pipeline_mode = #tpu.pipeline_mode<synchronous>, transform_indices = @transform_1, window_bounds = array<i64: 24, 128>}, {pipeline_mode = #tpu.pipeline_mode<synchronous>, transform_indices = @transform_2, window_bounds = array<i64: 1, 64>}]} {
    %c0 = arith.constant 0 : index
    %c0_0 = arith.constant 0 : index
    %0 = vector.load %arg2[%c0, %c0_0] : memref<64x64xf32, #tpu.memory_space<vmem>>, vector<64x64xf32>
    %c0_1 = arith.constant 0 : index
    %c0_2 = arith.constant 0 : index
    %1 = vector.load %arg3[%c0_1, %c0_2] : memref<24x128xf32, #tpu.memory_space<vmem>>, vector<16x3xf32>
    %c0_3 = arith.constant 0 : index
    %c3 = arith.constant 3 : index
    %2 = vector.load %arg3[%c0_3, %c3] : memref<24x128xf32, #tpu.memory_space<vmem>>, vector<16x1xf32>
    %c16 = arith.constant 16 : index
    %c0_4 = arith.constant 0 : index
    %3 = vector.load %arg3[%c16, %c0_4] : memref<24x128xf32, #tpu.memory_space<vmem>>, vector<1x16xf32>
    %c17 = arith.constant 17 : index
    %c0_5 = arith.constant 0 : index
    %4 = vector.load %arg3[%c17, %c0_5] : memref<24x128xf32, #tpu.memory_space<vmem>>, vector<1x1xf32>
    %c18 = arith.constant 18 : index
    %c0_6 = arith.constant 0 : index
    %5 = vector.load %arg3[%c18, %c0_6] : memref<24x128xf32, #tpu.memory_space<vmem>>, vector<3x64xf32>
    %cst = arith.constant dense<0.000000e+00> : vector<3x64xf32>
    %6 = tpu.matmul %5, %0, %cst {dimension_numbers = #tpu.dot_dimension_numbers<[1], [0], [0], [1], [0, 0, 1, 1], [], []>} : vector<3x64xf32>, vector<64x64xf32>, vector<3x64xf32> -> vector<3x64xf32>
    %cst_7 = arith.constant dense<0.000000e+00> : vector<16x64xf32>
    %7 = tpu.matmul %1, %6, %cst_7 {dimension_numbers = #tpu.dot_dimension_numbers<[1], [0], [0], [1], [0, 0, 1, 1], [], []>} : vector<16x3xf32>, vector<3x64xf32>, vector<16x64xf32> -> vector<16x64xf32>
    %8 = vector.broadcast %2 : vector<16x1xf32> to vector<16x64xf32>
    %9 = arith.addf %7, %8 : vector<16x64xf32>
    %cst_8 = arith.constant 0.000000e+00 : f32
    %10 = vector.broadcast %cst_8 : f32 to vector<16x64xf32>
    %11 = arith.maximumf %9, %10 : vector<16x64xf32>
    %cst_9 = arith.constant dense<0.000000e+00> : vector<1x64xf32>
    %12 = tpu.matmul %3, %11, %cst_9 {dimension_numbers = #tpu.dot_dimension_numbers<[1], [0], [0], [1], [0, 0, 1, 1], [], []>} : vector<1x16xf32>, vector<16x64xf32>, vector<1x64xf32> -> vector<1x64xf32>
    %cst_10 = arith.constant dense<0.000000e+00> : vector<1x64xf32>
    %13 = tpu.matmul %12, %0, %cst_10 {dimension_numbers = #tpu.dot_dimension_numbers<[1], [0], [0], [1], [0, 0, 1, 1], [], []>} : vector<1x64xf32>, vector<64x64xf32>, vector<1x64xf32> -> vector<1x64xf32>
    %14 = vector.broadcast %4 : vector<1x1xf32> to vector<1x64xf32>
    %15 = arith.addf %13, %14 : vector<1x64xf32>
    %c0_11 = arith.constant 0 : index
    %c0_12 = arith.constant 0 : index
    %16 = vector.load %arg4[%c0_11, %c0_12] : memref<1x64xf32, #tpu.memory_space<vmem>>, vector<1x64xf32>
    tpu.vector_store %arg4[%c0_11, %c0_12], %15 {strides = array<i32>} : memref<1x64xf32, #tpu.memory_space<vmem>>, vector<1x64xf32>,
    return
  }
  func.func @transform_0(%arg0: i32, %arg1: memref<1xi32, #tpu.memory_space<smem>>) -> (i32, i32) {
    %c0_i32 = arith.constant 0 : i32
    %c0_i32_0 = arith.constant 0 : i32
    %c0_i32_1 = arith.constant 0 : i32
    return %c0_i32, %c0_i32_0 : i32, i32
  }
  func.func @transform_1(%arg0: i32, %arg1: memref<1xi32, #tpu.memory_space<smem>>) -> (i32, i32) {
    %c0_i32 = arith.constant 0 : i32
    %c0_i32_0 = arith.constant 0 : i32
    %c0_i32_1 = arith.constant 0 : i32
    return %c0_i32, %c0_i32_0 : i32, i32
  }
  func.func @transform_2(%arg0: i32, %arg1: memref<1xi32, #tpu.memory_space<smem>>) -> (i32, i32) {
    %c0_i32 = arith.constant 0 : i32
    %c0_i32_0 = arith.constant 0 : i32
    %c0_i32_1 = arith.constant 0 : i32
    return %c0_i32, %c0_i32_0 : i32, i32
  }
}

</mosaic_0001>

<bundles_post_ra>
// kernel: fwd.1
= control target key start
LH: loop header
LB: loop body
LE: loop exit
PB: predicated region body
PF: predicated region fallthrough
CT: control target
= control target key end

     0   :  { %9 = vsyncpa [#allocation5], 0  ;;  %s617_s0 = inlined_call_operand.<no memory space> [shape: s32[1], index: 0, kind: input, shape index: {}]   ;;  %s618_s1 = inlined_call_operand.hbm [shape: f32[64,64], index: 1, kind: input, shape index: {}]   ;;  %s619_s2 = inlined_call_operand.hbm [shape: f32[24,128], index: 2, kind: input, shape index: {}]   ;;  %s620_s3 = inlined_call_operand.hbm [shape: f32[1,64], index: 3, kind: output, shape index: {}]  }
   0x1   :  { %10 = vsyncpa [#allocation8], 0 }
   0x2   :  { %11 = vsyncpa [#allocation6], 0  ;;  %s553_s12 = smov [#allocation4]  }
   0x3   :  { %s17_s13 = sshll.u32 %s553_s12, 4  ;;  %s18_s13 = int_to_ptr.vmem [resolvable:$true] %s17_s13 }
   0x4   :  { %s495_s14 = scalar_lea.vmem %s18_s13, 1024  ;;  %p500_p1 = scmp.lt.s32.totalorder %s18_s13, %s18_s13 }
   0x5   :  { %p496_p0 = scmp.ne.s32.totalorder %s18_s13, %s495_s14  ;;  %p501_p2 = scmp.lt.s32.totalorder %s495_s14, %s495_s14 }
   0x7   :  { %p502_p3 = por %p501_p2, %p500_p1 }
   0x9   :  { %p503_p4 = pnand %p502_p3, %p496_p0 }
   0xb   :  { %506 = shalt.err (!%p503_p4)
}
   0xc   :  { %s554_s0 = smov 128   ;;  %s555_s15 = smov 8  }
   0xd   :  { %23 = dma.hbm_to_vmem [thread:$0]  %s618_s1, 1024, %s18_s13, [#allocation5], %s554_s0, %s554_s0, %s555_s15  }
   0xe   :  { %s556_s18 = smov [#allocation7]  }
   0xf   :  { %s29_s19 = sshll.u32 %s556_s18, 4  ;;  %s30_s19 = int_to_ptr.vmem [resolvable:$true] %s29_s19 }
  0x10   :  { %s515_s20 = scalar_lea.vmem %s30_s19, 384  ;;  %p520_p6 = scmp.lt.s32.totalorder %s30_s19, %s30_s19 }
  0x11   :  { %p516_p5 = scmp.ne.s32.totalorder %s30_s19, %s515_s20  ;;  %p521_p7 = scmp.lt.s32.totalorder %s515_s20, %s515_s20 }
  0x13   :  { %p522_p8 = por %p521_p7, %p520_p6 }
  0x15   :  { %p523_p9 = pnand %p522_p8, %p516_p5 }
  0x17   :  { %526 = shalt.err (!%p523_p9)
}
  0x18   :  { %35 = dma.hbm_to_vmem [thread:$0]  %s619_s2, 384, %s30_s19, [#allocation8], %s554_s0, %s554_s0, %s555_s15  }
  0x19   :  { %547 = dma.done.wait [#allocation5], 1024  }
  0x1a   :  { %548 = vsyncadd [#allocation5], 4294966272 }
  0x1b   :  { %549 = dma.done.wait [#allocation8], 384  }
  0x1c   :  { %550 = vsyncadd [#allocation8], 4294966912  ;;  %v557_v0 = vmov 0.0   ;;  %vm558_vm0 = vmmov 0   ;;  %v49_v1 = vld [vmem:[#allocation4 + $0x38] sm:$0xff]  ;;  %v48_v2 = vld [vmem:[#allocation4 + $0x30] sm:$0xff] }
  0x1d   :  { %425 = vmatprep.subr.mxu0 %v557_v0  ;;  %441 = vmatprep.mubr.msk.f32.mxu0 %vm558_vm0, %v557_v0  ;;  %v47_v3 = vld [vmem:[#allocation4 + $0x28] sm:$0xff]  ;;  %v46_v4 = vld [vmem:[#allocation4 + $0x20] sm:$0xff]  ;;  %v45_v5 = vld [vmem:[#allocation4 + $0x18] sm:$0xff]  ;;  %vm55_vm1 = vcmask 523264   ;;  %vm139_vm2 = vcmask 23552   ;;  %v559_v12 = vmov 3  }
  0x1e   :  { %449 = vmatprep.subr.mxu1 %v557_v0  ;;  %453 = vmatprep.mubr.msk.f32.mxu1 %vm558_vm0, %v557_v0  ;;  %v44_v6 = vld [vmem:[#allocation4 + $0x10] sm:$0xff]  ;;  %v43_v7 = vld [vmem:[#allocation4 + $0x8] sm:$0xff]  ;;  %v42_v8 = vld [vmem:[#allocation4] sm:$0xff]  ;;  %vm144_vm3 = vcmask 1042432   ;;  %vm225_vm4 = vcmask 130048   ;;  %v560_v25 = vmov 0  }
  0x1f   :  { %426 = vmatpush3.msra.mxu0 %v49_v1  ;;  %v54_v9 = vld [vmem:[#allocation7 + $0x12] sm:$0x7]  ;;  %v50_v10 = vld [vmem:[#allocation7] sm:$0xff]  ;;  %v51_v11 = vld [vmem:[#allocation7 + $0x8] sm:$0xff]  ;;  %484 = vset.pattern.permute.xlu0 %v559_v12  ;;  %s561_s1 = smov [#allocation9]   ;;  %vm377_vm5 = vcmask 516096  }
  0x20   :  { %427 = vmatprep.subr.mxu0 %v557_v0  ;;  %136 = vperm.xlu0 %484, %v51_v11   ;;  %v52_v23 = vld [vmem:[#allocation7 + $0x10] sm:$0x1]  ;;  %v53_v24 = vld [vmem:[#allocation7 + $0x11] sm:$0x1]  ;;  %s385_s2 = sshll.u32 %s561_s1, 4  ;;  %s386_s2 = int_to_ptr.vmem [resolvable:$true] %s385_s2 }
  0x21   :  { %428 = vmatpush3.msra.mxu0 %v48_v2  ;;  %485 = vset.pattern.permute.xlu1 %v560_v25  ;;  %s527_s23 = scalar_lea.vmem %s386_s2, 16  ;;  %s531_s24 = scalar_lea.vmem %s386_s2, 32 }
  0x22   :  { %429 = vmatprep.subr.mxu0 %v557_v0  ;;  %301 = vperm.xlu1 %485, %v53_v24   ;;  %p528_p10 = scmp.ne.s32.totalorder %s386_s2, %s527_s23  ;;  %p532_p11 = scmp.lt.s32.totalorder %s386_s2, %s386_s2 }
  0x23   :  { %430 = vmatpush3.msra.mxu0 %v47_v3  ;;  %p533_p12 = scmp.lt.s32.totalorder %s531_s24, %s527_s23 }
  0x24   :  { %431 = vmatprep.subr.mxu0 %v557_v0  ;;  %131 = vperm.xlu0 %484, %v50_v10  }
  0x25   :  { %432 = vmatpush3.msra.mxu0 %v46_v4  ;;  %p534_p13 = por %p533_p12, %p532_p11 }
  0x26   :  { %433 = vmatprep.subr.mxu0 %v557_v0 }
  0x27   :  { %434 = vmatpush3.msra.mxu0 %v45_v5  ;;  %p535_p0 = pnand %p534_p13, %p528_p10 }
  0x28   :  { %435 = vmatprep.subr.mxu0 %v557_v0  ;;  %486 = vset.pattern.permute.xlu0 %v560_v25 }
  0x29   :  { %436 = vmatpush3.msra.mxu0 %v44_v6 }
  0x2a   :  { %437 = vmatprep.subr.mxu0 %v557_v0 }
  0x2b   :  { %438 = vmatpush3.msra.mxu0 %v43_v7 }
  0x2c   :  { %439 = vmatprep.subr.mxu0 %v557_v0 }
  0x2d   :  { %440 = vmatpush3.msra.mxu0 %v42_v8 }
  0x2e   :  { %442 = vmatmul.mubr.msk.f32.vlgmr.msra.gmra.mxu0 %vm55_vm1, %v54_v9 }
  0x2f   :  { %446 = vmatprep.mubr.msk.f32.mxu0 %vm139_vm2, %v50_v10 }
  0x9b   :  { %v137_v15 = vpop.permute.xlu0 %136 }
  0x9d   :  { %v302_v28 = vpop.permute.xlu1 %301 }
  0x9f   :  { %v132_v18 = vpop.permute.xlu0 %131 }
  0xee   :  { %v125_v13 = vpop.f32.mrf.mxu0 }
  0xef   :  { %444 = vmatprep.subr.msk.mxu0 %vm144_vm3, %v125_v13 }
  0xf0   :  { %v443_v14 = vpop.f32.mrf.mxu0  ;;  %445 = vmatpush3.msk.msra.mxu0 %vm144_vm3, %v125_v13 }
  0xf1   :  { %447 = vmatmul.mubr.msk.f32.vlgmr.msra.gmra.mxu0 %vm139_vm2, %v51_v11 }
 0x1b1   :  { %v448_v16 = vpop.f32.mrf.mxu0 }
 0x1b2   :  { %v220_v17 = vadd.f32 %v448_v16, %v137_v15 }
 0x1b3   :  { %v214_v19 = vpop.f32.mrf.mxu0 }
 0x1b4   :  { %v224_v20 = vmax.f32 %v220_v17, 0.0  ;;  %v215_v21 = vadd.f32 %v214_v19, %v132_v18 }
 0x1b6   :  { %v223_v22 = vmax.f32 %v215_v21, 0.0  ;;  %450 = vmatpush3.msra.mxu1 %v224_v20 }
 0x1b7   :  { %451 = vmatprep.subr.mxu1 %v557_v0 }
 0x1b8   :  { %452 = vmatpush3.msra.mxu1 %v223_v22 }
 0x1b9   :  { %454 = vmatmul.mubr.msk.f32.vlgmr.msra.gmra.mxu1 %vm225_vm4, %v52_v23  ;;  %456 = vmatprep.subr.mxu1 %v557_v0 }
 0x1ba   :  { %457 = vmatpush3.msra.mxu1 %v49_v1  ;;  %472 = vmatprep.mubr.msk.f32.mxu1 %vm558_vm0, %v557_v0 }
 0x1bb   :  { %458 = vmatprep.subr.mxu1 %v557_v0 }
 0x1bc   :  { %459 = vmatpush3.msra.mxu1 %v48_v2 }
 0x1bd   :  { %460 = vmatprep.subr.mxu1 %v557_v0 }
 0x1be   :  { %461 = vmatpush3.msra.mxu1 %v47_v3 }
 0x1bf   :  { %462 = vmatprep.subr.mxu1 %v557_v0 }
 0x1c0   :  { %463 = vmatpush3.msra.mxu1 %v46_v4 }
 0x1c1   :  { %464 = vmatprep.subr.mxu1 %v557_v0 }
 0x1c2   :  { %465 = vmatpush3.msra.mxu1 %v45_v5 }
 0x1c3   :  { %466 = vmatprep.subr.mxu1 %v557_v0 }
 0x1c4   :  { %467 = vmatpush3.msra.mxu1 %v44_v6 }
 0x1c5   :  { %468 = vmatprep.subr.mxu1 %v557_v0 }
 0x1c6   :  { %469 = vmatpush3.msra.mxu1 %v43_v7 }
 0x1c7   :  { %470 = vmatprep.subr.mxu1 %v557_v0 }
 0x1c8   :  { %471 = vmatpush3.msra.mxu1 %v42_v8 }
 0x279   :  { %v295_v26 = vpop.f32.mrf.mxu1 }
 0x27a   :  { %473 = vmatmul.mubr.msk.f32.vlgmr.msra.gmra.mxu1 %vm55_vm1, %v295_v26 }
 0x27b   :  { %v455_v27 = vpop.f32.mrf.mxu1 }
 0x33a   :  { %v373_v29 = vpop.f32.mrf.mxu1 }
 0x33b   :  { %v374_v30 = vadd.f32 %v373_v29, %v302_v28 }
 0x33c   :  { %v474_v31 = vpop.f32.mrf.mxu1 }
 0x33d   :  { %378 = vst.msk [vmem:[#allocation9] sm:$0x1] %vm377_vm5, %v374_v30 }
 0x33e   :  { %538 = shalt.err (!%p535_p0)
}
 0x33f   :  { %388 = dma.vmem_to_hbm [thread:$0]  %s386_s2, 16, %s620_s3, [#allocation6]  }
 0x340   :  { %551 = dma.done.wait [#allocation6], 16  }
 0x341   :  { %552 = vsyncadd [#allocation6], 4294967280 }
 0x342   :  { %392 = vsyncpa [#allocation5], 1 }
 0x343   :  { %393 = vsyncpa [#allocation8], 1 }
 0x344   :  { %394 = vsyncpa [#allocation6], 1 }

</bundles_post_ra>
